<compile_context>
chip_gen: v5e
topology: v5e:2x2
jax: 0.10.0
libtpu: 0.0.40
codegen_flags: <defaults>
</compile_context>

<pallas_src>
import math
from functools import partial

import jax
import jax.numpy as jnp
from jax.experimental import pallas as pl
from jax.experimental.pallas import tpu as pltpu

HIDDEN = 128
FEAT = 2           # handcrafted features per (example, bit): [diff, num_diff]
FEAT_PAD = 8       # zero-pad fc1's K dim to a sublane-aligned width
_ROW_ALIGN = 128   # MXU-friendly M tile; also satisfies the (8, 128) block rule

_C1 = 0.7978845608028654           # sqrt(2/pi)
_C2 = _C1 * 0.044715


def _gelu_tanh(x):
    # tanh-approximate GELU, restructured to trim VALU ops:
    #   y = hx + hx*t,  t = tanh(x*(c1 + c2*x^2)),  hx = 0.5*x
    # Max abs deviation from torch's exact erf GELU is < 3e-3.
    x2 = x * x
    t = jnp.tanh(x * (_C1 + _C2 * x2))
    hx = 0.5 * x
    return hx + hx * t


def _make_kernel(compute_dtype):
    def kernel(x_ref, w1_ref, b1_ref, w2_ref, b2_ref, w3_ref, b3_ref, o_ref):
        # fc1 on the MXU: (TR, 8) @ (8, 128), bf16 operands, f32 accumulation.
        # Bias add is a cheap sublane-broadcast of a (1, 128) row.
        h1 = jnp.dot(x_ref[...], w1_ref[...],
                     preferred_element_type=jnp.float32) + b1_ref[...]
        h1 = _gelu_tanh(h1.astype(compute_dtype))

        # fc2 on the MXU: (TR, 128) @ (128, 128).
        h2 = jnp.dot(h1.astype(jnp.bfloat16), w2_ref[...],
                     preferred_element_type=jnp.float32) + b2_ref[...]
        h2 = _gelu_tanh(h2.astype(compute_dtype))

        # fc3 on the MXU: (TR, 128) @ (128, 1); scalar bias lives in SMEM.
        out = jnp.dot(h2.astype(jnp.bfloat16), w3_ref[...],
                      preferred_element_type=jnp.float32)
        o_ref[...] = out + b3_ref[0]
    return kernel


def _round_up(x, m):
    return ((x + m - 1) // m) * m


def _tune_for_device():
    try:
        kind = jax.devices()[0].device_kind.lower()
    except Exception:
        kind = ""
    if "v7" in kind:
        # v7x: 64 MiB physical VMEM, 2 TensorCores -> modest tiles, >=2 steps.
        return dict(target_rows=4096, vmem_limit=48 * 1024 * 1024,
                    min_steps=2, compute_dtype=jnp.bfloat16)
    if "v6" in kind:
        # v6e: bf16 VPU/EUP -> bf16 elementwise; 128 MiB VMEM -> bigger tiles.
        return dict(target_rows=8192, vmem_limit=64 * 1024 * 1024,
                    min_steps=1, compute_dtype=jnp.bfloat16)
    # v5e and older / unknown: no bf16 VPU/EUP -> keep elementwise math in f32.
    return dict(target_rows=8192, vmem_limit=64 * 1024 * 1024,
                min_steps=1, compute_dtype=jnp.float32)


def _choose_tile_rows(total_rows, target_rows, min_steps):
    total_aligned = _round_up(max(total_rows, 1), _ROW_ALIGN)
    steps = pl.cdiv(total_aligned, target_rows)
    if total_aligned // _ROW_ALIGN >= min_steps:
        steps = max(steps, min_steps)
    return _round_up(pl.cdiv(total_aligned, steps), _ROW_ALIGN)


@partial(jax.jit, static_argnames=("compute_dtype",))
def bitflip_dqn_forward(state, goal, prepared_params, compute_dtype=None):
    """state, goal: (B, n) float32.  Returns Q-values of shape (B, n)."""
    w1, b1, w2, b2, w3, b3 = prepared_params
    B, n = state.shape
    rows = B * n

    tune = _tune_for_device()
    if compute_dtype is None:
        compute_dtype = tune["compute_dtype"]

    # Handcrafted features, built XLA-side so no relayouts happen in-kernel:
    # one MLP row per (example, bit) with features [squared diff, Hamming dist].
    diff = jnp.square(state - goal)                                     # (B, n)
    numd = jnp.broadcast_to(jnp.sum(diff, axis=1, keepdims=True), diff.shape)
    x = jnp.stack([diff, numd], axis=-1).reshape(rows, FEAT)            # (rows, 2)
    x = x.astype(jnp.bfloat16)                                          # MXU operand dtype

    tile = _choose_tile_rows(rows, tune["target_rows"], tune["min_steps"])
    rows_pad = pl.cdiv(rows, tile) * tile
    # Zero-pad rows up to the grid and the fc1 K dim up to FEAT_PAD (exact math).
    x = jnp.pad(x, ((0, rows_pad - rows), (0, FEAT_PAD - FEAT)))

    grid = (rows_pad // tile,)
    resident = lambda shape: pl.BlockSpec(shape, lambda i: (0, 0))

    cost = pl.CostEstimate(
        flops=rows_pad * (2 * FEAT_PAD * HIDDEN + 2 * HIDDEN * HIDDEN + 2 * HIDDEN),
        transcendentals=2 * rows_pad * HIDDEN,
        bytes_accessed=rows_pad * (FEAT_PAD * 2 + 4)
        + (FEAT_PAD * HIDDEN + HIDDEN * HIDDEN + HIDDEN) * 2
        + 2 * HIDDEN * 4 + 4,
    )

    out = pl.pallas_call(
        _make_kernel(compute_dtype),
        out_shape=jax.ShapeDtypeStruct((rows_pad, 1), jnp.float32),
        grid=grid,
        in_specs=[
            pl.BlockSpec((tile, FEAT_PAD), lambda i: (i, 0)),           # x rows
            resident((FEAT_PAD, HIDDEN)),                               # w1 (bf16)
            resident((1, HIDDEN)),                                      # b1
            resident((HIDDEN, HIDDEN)),                                 # w2 (bf16)
            resident((1, HIDDEN)),                                      # b2
            resident((HIDDEN, 1)),                                      # w3 (bf16 column)
            pl.BlockSpec(memory_space=pltpu.MemorySpace.SMEM),          # b3 scalar
        ],
        out_specs=pl.BlockSpec((tile, 1), lambda i: (i, 0)),
        compiler_params=pltpu.CompilerParams(
            dimension_semantics=("parallel",),
            vmem_limit_bytes=tune["vmem_limit"],
        ),
        cost_estimate=cost,
    )(x, w1, b1, w2, b2, w3, b3)

    return out[:rows, 0].reshape(B, n)


def init_params(key):
    """f32 params, nn.Linear-style U(-1/sqrt(fan_in), 1/sqrt(fan_in)) init.
    Stored as (in_features, out_features); w3 as (128,), b3 as (1,)."""
    k1, k2, k3, k4, k5, k6 = jax.random.split(key, 6)

    def unif(k, shape, fan_in):
        bound = 1.0 / math.sqrt(fan_in)
        return jax.random.uniform(k, shape, jnp.float32, -bound, bound)

    w1 = unif(k1, (FEAT, HIDDEN), FEAT)
    b1 = unif(k2, (HIDDEN,), FEAT)
    w2 = unif(k3, (HIDDEN, HIDDEN), HIDDEN)
    b2 = unif(k4, (HIDDEN,), HIDDEN)
    w3 = unif(k5, (HIDDEN,), HIDDEN)
    b3 = unif(k6, (1,), HIDDEN)
    return (w1, b1, w2, b2, w3, b3)


def prepare_params(params):
    """One-time conversion to kernel layouts/dtypes; hoists all bf16 weight
    casts out of the forward path (done once, reused by every call)."""
    w1, b1, w2, b2, w3, b3 = params
    w1p = jnp.zeros((FEAT_PAD, HIDDEN), jnp.bfloat16).at[:FEAT].set(
        w1.astype(jnp.bfloat16))
    return (
        w1p,                                           # (8, 128)  bf16, zero-padded K
        b1.reshape(1, HIDDEN).astype(jnp.float32),     # (1, 128)
        w2.astype(jnp.bfloat16),                       # (128, 128) bf16
        b2.reshape(1, HIDDEN).astype(jnp.float32),     # (1, 128)
        w3.reshape(HIDDEN, 1).astype(jnp.bfloat16),    # (128, 1)  bf16 (fc3 on MXU)
        b3.reshape(1).astype(jnp.float32),             # (1,)      scalar in SMEM
    )


def reference_forward(state, goal, params):
    """Pure-JAX mirror of the PyTorch module (exact erf GELU, f32 math)."""
    w1, b1, w2, b2, w3, b3 = params
    diff = (state - goal) ** 2
    numd = jnp.broadcast_to(jnp.sum(diff, axis=1, keepdims=True), diff.shape)
    x = jnp.stack([diff, numd], axis=2)                       # (B, n, 2)
    h = jax.nn.gelu(x @ w1 + b1, approximate=False)
    h = jax.nn.gelu(h @ w2 + b2, approximate=False)
    return jnp.dot(h, w3) + b3[0]                             # (B, n)


def reference_forward_kernel_numerics(state, goal, params,
                                      compute_dtype=jnp.float32):
    """Reference mirroring the kernel's numerics (tanh GELU, bf16 MXU operands)."""
    w1, b1, w2, b2, w3, b3 = params
    diff = (state - goal) ** 2
    numd = jnp.broadcast_to(jnp.sum(diff, axis=1, keepdims=True), diff.shape)
    x = jnp.stack([diff, numd], axis=2).astype(jnp.bfloat16)
    h1 = jnp.dot(x, w1.astype(jnp.bfloat16),
                 preferred_element_type=jnp.float32) + b1
    h1 = _gelu_tanh(h1.astype(compute_dtype))
    h2 = jnp.dot(h1.astype(jnp.bfloat16), w2.astype(jnp.bfloat16),
                 preferred_element_type=jnp.float32) + b2
    h2 = _gelu_tanh(h2.astype(compute_dtype))
    out = jnp.dot(h2.astype(jnp.bfloat16), w3.astype(jnp.bfloat16),
                  preferred_element_type=jnp.float32)
    return out + b3[0]


if __name__ == "__main__":
    B, n = 2, 8
    key = jax.random.PRNGKey(0)
    kp, ks, kg = jax.random.split(key, 3)

    params = init_params(kp)
    prepared = prepare_params(params)

    # Bit-flipping env states/goals are 0/1 bit vectors.
    state = jax.random.bernoulli(ks, 0.5, (B, n)).astype(jnp.float32)
    goal = jax.random.bernoulli(kg, 0.5, (B, n)).astype(jnp.float32)

    ref_exact = reference_forward(state, goal, params)

    # 1) f32-elementwise path (valid on every TPU generation): tight checks.
    out_f32 = jax.block_until_ready(
        bitflip_dqn_forward(state, goal, prepared, compute_dtype=jnp.float32))
    assert out_f32.shape == (B, n)
    ref_mirror = reference_forward_kernel_numerics(state, goal, params, jnp.float32)
    assert jnp.allclose(out_f32, ref_mirror, atol=1e-2, rtol=1e-2), (out_f32, ref_mirror)
    # Looser check vs the exact erf/f32 PyTorch-equivalent forward
    # (tanh-GELU + bf16 MXU operands introduce small, bounded drift).
    assert jnp.allclose(out_f32, ref_exact, atol=1e-1, rtol=1e-1), (out_f32, ref_exact)

    # 2) Device-tuned path (bf16 elementwise on v6e/v7x, f32 elsewhere): sanity check.
    out_auto = jax.block_until_ready(bitflip_dqn_forward(state, goal, prepared))
    assert out_auto.shape == (B, n)
    assert jnp.allclose(out_auto, ref_exact, atol=2e-1, rtol=2e-1), (out_auto, ref_exact)

    print("KERNEL_OK")
</pallas_src>

<mosaic_0001>
module attributes {stable_mosaic.version = 11 : i64} {
  func.func @kernel(%arg0: i32, %arg1: memref<128x8xbf16, #tpu.memory_space<vmem>>, %arg2: memref<8x128xbf16, #tpu.memory_space<vmem>>, %arg3: memref<1x128xf32, #tpu.memory_space<vmem>>, %arg4: memref<128x128xbf16, #tpu.memory_space<vmem>>, %arg5: memref<1x128xf32, #tpu.memory_space<vmem>>, %arg6: memref<128x1xbf16, #tpu.memory_space<vmem>>, %arg7: memref<1xf32, #tpu.memory_space<smem>>, %arg8: memref<128x1xf32, #tpu.memory_space<vmem>>) attributes {dimension_semantics = [#tpu.dimension_semantics<parallel>], iteration_bounds = array<i64: 1>, scalar_prefetch = 0 : i64, scratch_operands = 0 : i64, tpu.core_type = #tpu.core_type<tc>, window_params = [{transform_indices = @transform_0, window_bounds = array<i64: 128, 8>}, {pipeline_mode = #tpu.pipeline_mode<synchronous>, transform_indices = @transform_1, window_bounds = array<i64: 8, 128>}, {pipeline_mode = #tpu.pipeline_mode<synchronous>, transform_indices = @transform_2, window_bounds = array<i64: 1, 128>}, {pipeline_mode = #tpu.pipeline_mode<synchronous>, transform_indices = @transform_3, window_bounds = array<i64: 128, 128>}, {pipeline_mode = #tpu.pipeline_mode<synchronous>, transform_indices = @transform_4, window_bounds = array<i64: 1, 128>}, {pipeline_mode = #tpu.pipeline_mode<synchronous>, transform_indices = @transform_5, window_bounds = array<i64: 128, 1>}, {transform_indices = @transform_6, window_bounds = array<i64: 1>}, {transform_indices = @transform_7, window_bounds = array<i64: 128, 1>}]} {
    %c0 = arith.constant 0 : index
    %c0_0 = arith.constant 0 : index
    %0 = vector.load %arg1[%c0, %c0_0] : memref<128x8xbf16, #tpu.memory_space<vmem>>, vector<128x8xbf16>
    %c0_1 = arith.constant 0 : index
    %c0_2 = arith.constant 0 : index
    %1 = vector.load %arg2[%c0_1, %c0_2] : memref<8x128xbf16, #tpu.memory_space<vmem>>, vector<8x128xbf16>
    %cst = arith.constant dense<0.000000e+00> : vector<128x128xf32>
    %2 = tpu.matmul %0, %1, %cst {dimension_numbers = #tpu.dot_dimension_numbers<[1], [0], [0], [1], [0, 0, 1, 1], [], []>} : vector<128x8xbf16>, vector<8x128xbf16>, vector<128x128xf32> -> vector<128x128xf32>
    %c0_3 = arith.constant 0 : index
    %c0_4 = arith.constant 0 : index
    %3 = vector.load %arg3[%c0_3, %c0_4] : memref<1x128xf32, #tpu.memory_space<vmem>>, vector<1x128xf32>
    %4 = vector.broadcast %3 : vector<1x128xf32> to vector<128x128xf32>
    %5 = arith.addf %2, %4 : vector<128x128xf32>
    %6 = arith.mulf %5, %5 : vector<128x128xf32>
    %cst_5 = arith.constant 0.0356774069 : f32
    %7 = vector.broadcast %cst_5 : f32 to vector<128x128xf32>
    %8 = arith.mulf %7, %6 : vector<128x128xf32>
    %cst_6 = arith.constant 0.797884583 : f32
    %9 = vector.broadcast %cst_6 : f32 to vector<128x128xf32>
    %10 = arith.addf %9, %8 : vector<128x128xf32>
    %11 = arith.mulf %5, %10 : vector<128x128xf32>
    %12 = math.tanh %11 : vector<128x128xf32>
    %cst_7 = arith.constant 5.000000e-01 : f32
    %13 = vector.broadcast %cst_7 : f32 to vector<128x128xf32>
    %14 = arith.mulf %13, %5 : vector<128x128xf32>
    %15 = arith.mulf %14, %12 : vector<128x128xf32>
    %16 = arith.addf %14, %15 : vector<128x128xf32>
    %17 = arith.truncf %16 : vector<128x128xf32> to vector<128x128xbf16>
    %c0_8 = arith.constant 0 : index
    %c0_9 = arith.constant 0 : index
    %18 = vector.load %arg4[%c0_8, %c0_9] : memref<128x128xbf16, #tpu.memory_space<vmem>>, vector<128x128xbf16>
    %cst_10 = arith.constant dense<0.000000e+00> : vector<128x128xf32>
    %19 = tpu.matmul %17, %18, %cst_10 {dimension_numbers = #tpu.dot_dimension_numbers<[1], [0], [0], [1], [0, 0, 1, 1], [], []>} : vector<128x128xbf16>, vector<128x128xbf16>, vector<128x128xf32> -> vector<128x128xf32>
    %c0_11 = arith.constant 0 : index
    %c0_12 = arith.constant 0 : index
    %20 = vector.load %arg5[%c0_11, %c0_12] : memref<1x128xf32, #tpu.memory_space<vmem>>, vector<1x128xf32>
    %21 = vector.broadcast %20 : vector<1x128xf32> to vector<128x128xf32>
    %22 = arith.addf %19, %21 : vector<128x128xf32>
    %23 = arith.mulf %22, %22 : vector<128x128xf32>
    %cst_13 = arith.constant 0.0356774069 : f32
    %24 = vector.broadcast %cst_13 : f32 to vector<128x128xf32>
    %25 = arith.mulf %24, %23 : vector<128x128xf32>
    %cst_14 = arith.constant 0.797884583 : f32
    %26 = vector.broadcast %cst_14 : f32 to vector<128x128xf32>
    %27 = arith.addf %26, %25 : vector<128x128xf32>
    %28 = arith.mulf %22, %27 : vector<128x128xf32>
    %29 = math.tanh %28 : vector<128x128xf32>
    %cst_15 = arith.constant 5.000000e-01 : f32
    %30 = vector.broadcast %cst_15 : f32 to vector<128x128xf32>
    %31 = arith.mulf %30, %22 : vector<128x128xf32>
    %32 = arith.mulf %31, %29 : vector<128x128xf32>
    %33 = arith.addf %31, %32 : vector<128x128xf32>
    %34 = arith.truncf %33 : vector<128x128xf32> to vector<128x128xbf16>
    %c0_16 = arith.constant 0 : index
    %c0_17 = arith.constant 0 : index
    %35 = vector.load %arg6[%c0_16, %c0_17] : memref<128x1xbf16, #tpu.memory_space<vmem>>, vector<128x1xbf16>
    %cst_18 = arith.constant dense<0.000000e+00> : vector<128x1xf32>
    %36 = tpu.matmul %34, %35, %cst_18 {dimension_numbers = #tpu.dot_dimension_numbers<[1], [0], [0], [1], [0, 0, 1, 1], [], []>} : vector<128x128xbf16>, vector<128x1xbf16>, vector<128x1xf32> -> vector<128x1xf32>
    %c0_19 = arith.constant 0 : index
    %37 = memref.load %arg7[%c0_19] : memref<1xf32, #tpu.memory_space<smem>>
    %38 = vector.broadcast %37 : f32 to vector<128x1xf32>
    %39 = arith.addf %36, %38 : vector<128x1xf32>
    %c0_20 = arith.constant 0 : index
    %c0_21 = arith.constant 0 : index
    %40 = vector.load %arg8[%c0_20, %c0_21] : memref<128x1xf32, #tpu.memory_space<vmem>>, vector<128x1xf32>
    tpu.vector_store %arg8[%c0_20, %c0_21], %39 {strides = array<i32>} : memref<128x1xf32, #tpu.memory_space<vmem>>, vector<128x1xf32>,
    return
  }
  func.func @transform_0(%arg0: i32) -> (i32, i32) {
    %c0_i32 = arith.constant 0 : i32
    %c0_i32_0 = arith.constant 0 : i32
    return %arg0, %c0_i32 : i32, i32
  }
  func.func @transform_1(%arg0: i32) -> (i32, i32) {
    %c0_i32 = arith.constant 0 : i32
    %c0_i32_0 = arith.constant 0 : i32
    %c0_i32_1 = arith.constant 0 : i32
    return %c0_i32, %c0_i32_0 : i32, i32
  }
  func.func @transform_2(%arg0: i32) -> (i32, i32) {
    %c0_i32 = arith.constant 0 : i32
    %c0_i32_0 = arith.constant 0 : i32
    %c0_i32_1 = arith.constant 0 : i32
    return %c0_i32, %c0_i32_0 : i32, i32
  }
  func.func @transform_3(%arg0: i32) -> (i32, i32) {
    %c0_i32 = arith.constant 0 : i32
    %c0_i32_0 = arith.constant 0 : i32
    %c0_i32_1 = arith.constant 0 : i32
    return %c0_i32, %c0_i32_0 : i32, i32
  }
  func.func @transform_4(%arg0: i32) -> (i32, i32) {
    %c0_i32 = arith.constant 0 : i32
    %c0_i32_0 = arith.constant 0 : i32
    %c0_i32_1 = arith.constant 0 : i32
    return %c0_i32, %c0_i32_0 : i32, i32
  }
  func.func @transform_5(%arg0: i32) -> (i32, i32) {
    %c0_i32 = arith.constant 0 : i32
    %c0_i32_0 = arith.constant 0 : i32
    %c0_i32_1 = arith.constant 0 : i32
    return %c0_i32, %c0_i32_0 : i32, i32
  }
  func.func @transform_6(%arg0: i32) -> i32 {
    %c0_i32 = arith.constant 0 : i32
    %c0_i32_0 = arith.constant 0 : i32
    return %c0_i32 : i32
  }
  func.func @transform_7(%arg0: i32) -> (i32, i32) {
    %c0_i32 = arith.constant 0 : i32
    %c0_i32_0 = arith.constant 0 : i32
    return %arg0, %c0_i32 : i32, i32
  }
}

</mosaic_0001>

<bundles_post_ra>
// kernel: squeeze.1
= control target key start
LH: loop header
LB: loop body
LE: loop exit
PB: predicated region body
PF: predicated region fallthrough
CT: control target
= control target key end

     0   :  { %s80_s0 = inlined_call_operand.vmem [shape: f32[16], index: 0, kind: input, shape index: {}]   ;;  %s81_s1 = inlined_call_operand.hbm [shape: f32[2,8], index: 1, kind: output, shape index: {}]  }
   0x1   :  { %v5_v0 = vld [vmem:[%s80_s0] sm:$0x1] }
   0x2   :  { %2 = vsyncpa [#allocation1], 0  ;;  %6 = vst [vmem:[#allocation3] sm:$0x1] %v5_v0  ;;  %vm8_vm0 = vcmask 64512   ;;  %s62_s0 = smov 120  }
   0x3   :  { %s63_s8 = smov [#allocation0]   ;;  %s27_s1 = sshll.u32 %s81_s1, 4  ;;  %s28_s1 = int_to_ptr.hbm [resolvable:$true] %s27_s1 }
   0x4   :  { %s25_s9 = sshll.u32 %s63_s8, 4  ;;  %s26_s9 = int_to_ptr.vmem [resolvable:$true] %s25_s9 }
   0x9   :  { %v10_v1 = vld [vmem:[#allocation3] sm:$0x1]  }
   0xa   :  { %v7_v2 = vld [vmem:[#allocation3] sm:$0x1]   ;;  %11 = vrot.lane.b32.xlu0 %v10_v1, %s62_s0 }
   0xb   :  { %9 = vst.msk [vmem:[#allocation2] sm:$0x1] %vm8_vm0, %v7_v2  }
  0x7c   :  { %v12_v3 = vpop.permute.xlu0 %11  }
  0x7d   :  { %15 = vst.msk [vmem:[#allocation2 + $0x1] sm:$0x1] %vm8_vm0, %v12_v3  }
  0x84   :  { %v18_v4 = vld [vmem:[#allocation2] sm:$0x3] }
  0x85   :  { %21 = vst [vmem:[#allocation0] sm:$0x3] %v18_v4 }
  0x86   :  { %30 = dma.vmem_to_hbm [thread:$0]  %s26_s9, 32, %s28_s1, [#allocation1]  }
  0x87   :  { %60 = dma.done.wait [#allocation1], 32  }
  0x88   :  { %61 = vsyncadd [#allocation1], 4294967264 }
  0x89   :  { %33 = vsyncpa [#allocation1], 1 }

// kernel: bitflip_dqn_forward.1
= control target key start
LH: loop header
LB: loop body
LE: loop exit
PB: predicated region body
PF: predicated region fallthrough
CT: control target
= control target key end

     0   :  { %vm114_vm0 = vcmask 1043456   ;;  %vm89_vm1 = vcmask 64512   ;;  %vm671_vm2 = vcmask 7168   ;;  %s1134_s1 = inlined_call_operand.vmem [shape: bf16[8,128], index: 1, kind: input, shape index: {}]   ;;  %s1135_s0 = inlined_call_operand.vmem [shape: bf16[128,8], index: 0, kind: input, shape index: {}]   ;;  %s1136_s2 = inlined_call_operand.vmem [shape: f32[1,128], index: 2, kind: input, shape index: {}]   ;;  %s1137_s3 = inlined_call_operand.vmem [shape: bf16[128,128], index: 3, kind: input, shape index: {}]   ;;  %s1138_s4 = inlined_call_operand.vmem [shape: f32[1,128], index: 4, kind: input, shape index: {}]   ;;  %s1139_s5 = inlined_call_operand.vmem [shape: bf16[128,1], index: 5, kind: input, shape index: {}]   ;;  %s1140_s6 = inlined_call_operand.<no memory space> [shape: f32[1], index: 6, kind: input, shape index: {}]   ;;  %s1141_s7 = inlined_call_operand.vmem [shape: f32[128,1], index: 7, kind: output, shape index: {}]  }
   0x1   :  { %v44_v0 = vld [vmem:[%s1134_s1] sm:$0xf]  ;;  %v797_v3 = vld [vmem:[%s1135_s0 + $0x8] sm:$0xff]  ;;  %v798_v4 = vld [vmem:[%s1135_s0 + $0x10] sm:$0xff] }
   0x2   :  { %v116_v1 = vsel %vm114_vm0, %v44_v0, 0  ;;  %v796_v2 = vld [vmem:[%s1135_s0] sm:$0xff]  ;;  %v799_v5 = vld [vmem:[%s1135_s0 + $0x18] sm:$0xff]  ;;  %v801_v7 = vld [vmem:[%s1135_s0 + $0x28] sm:$0xff] }
   0x3   :  { %125 = vmatpush.bf16.msra.mxu0 %v116_v1  ;;  %v800_v6 = vld [vmem:[%s1135_s0 + $0x20] sm:$0xff]  ;;  %v802_v8 = vld [vmem:[%s1135_s0 + $0x30] sm:$0xff]  ;;  %v811_v9 = vld [vmem:[%s1137_s3 + $0x38] sm:$0xff] }
   0x4   :  { %371 = vmatpush.bf16.msra.mxu1 %v811_v9  ;;  %820 = vmatpush.bf16.msra.mxu3 %v811_v9  ;;  %v810_v10 = vld [vmem:[%s1137_s3 + $0x30] sm:$0xff]  ;;  %v809_v11 = vld [vmem:[%s1137_s3 + $0x28] sm:$0xff]  ;;  %v808_v12 = vld [vmem:[%s1137_s3 + $0x20] sm:$0xff] }
   0x5   :  { %v803_v13 = vld [vmem:[%s1135_s0 + $0x38] sm:$0xff]  ;;  %v806_v15 = vld [vmem:[%s1137_s3 + $0x10] sm:$0xff]  ;;  %v805_v16 = vld [vmem:[%s1137_s3 + $0x8] sm:$0xff] }
   0x6   :  { %724 = vmatmul.msk.bf16.vlgmr.msra.gmra.mxu0 %vm89_vm1, %v796_v2  ;;  %v807_v14 = vld [vmem:[%s1137_s3 + $0x18] sm:$0xff]  ;;  %v804_v17 = vld [vmem:[%s1137_s3] sm:$0xff] }
   0x7   :  { %v1004_v18 = vld [vmem:[%s1136_s2] ss:$0 sm:$0xff] }
   0x8   :  { %372 = vmatpush.bf16.msra.mxu1 %v810_v10  ;;  %821 = vmatpush.bf16.msra.mxu3 %v810_v10 }
   0xc   :  { %373 = vmatpush.bf16.msra.mxu1 %v809_v11  ;;  %822 = vmatpush.bf16.msra.mxu3 %v809_v11 }
  0x10   :  { %374 = vmatpush.bf16.msra.mxu1 %v808_v12  ;;  %823 = vmatpush.bf16.msra.mxu3 %v808_v12 }
  0x14   :  { %375 = vmatpush.bf16.msra.mxu1 %v807_v14  ;;  %824 = vmatpush.bf16.msra.mxu3 %v807_v14 }
  0x16   :  { %725 = vmatmul.msk.bf16.gmra.mxu0 %vm89_vm1, %v797_v3 }
  0x18   :  { %376 = vmatpush.bf16.msra.mxu1 %v806_v15  ;;  %825 = vmatpush.bf16.msra.mxu3 %v806_v15 }
  0x1c   :  { %377 = vmatpush.bf16.msra.mxu1 %v805_v16  ;;  %826 = vmatpush.bf16.msra.mxu3 %v805_v16 }
  0x20   :  { %378 = vmatpush.bf16.msra.mxu1 %v804_v17  ;;  %827 = vmatpush.bf16.msra.mxu3 %v804_v17 }
  0x26   :  { %726 = vmatmul.msk.bf16.gmra.mxu0 %vm89_vm1, %v798_v4 }
  0x36   :  { %727 = vmatmul.msk.bf16.gmra.mxu0 %vm89_vm1, %v799_v5 }
  0x46   :  { %728 = vmatmul.msk.bf16.gmra.mxu0 %vm89_vm1, %v800_v6 }
  0x56   :  { %729 = vmatmul.msk.bf16.gmra.mxu0 %vm89_vm1, %v801_v7 }
  0x66   :  { %730 = vmatmul.msk.bf16.gmra.mxu0 %vm89_vm1, %v802_v8 }
  0x76   :  { %731 = vmatmul.msk.bf16.gmra.mxu0 %vm89_vm1, %v803_v13 }
  0x83   :  { %v127_v19 = vpop.f32.mrf.mxu0 }
  0x84   :  { %v128_v20 = vadd.f32 %v1004_v18, %v127_v19 }
  0x86   :  { %v167_v21 = vmul.f32 %v128_v20, %v128_v20  ;;  %v247_v36 = vmul.f32 0.5, %v128_v20 }
  0x88   :  { %v183_v22 = vmul.f32 0.035677407, %v167_v21 }
  0x8a   :  { %v199_v23 = vadd.f32 0.7978846, %v183_v22 }
  0x8b   :  { %v129_v24 = vpop.f32.mrf.mxu0 }
  0x8c   :  { %v130_v25 = vadd.f32 %v1004_v18, %v129_v24  ;;  %v215_v26 = vmul.f32 %v199_v23, %v128_v20 }
  0x8e   :  { %v168_v27 = vmul.f32 %v130_v25, %v130_v25  ;;  %838 = vtanh.f32 %v215_v26  ;;  %v248_v38 = vmul.f32 0.5, %v130_v25 }
  0x90   :  { %v184_v28 = vmul.f32 0.035677407, %v168_v27 }
  0x92   :  { %v200_v29 = vadd.f32 0.7978846, %v184_v28 }
  0x93   :  { %v132_v30 = vpop.f32.mrf.mxu0 }
  0x94   :  { %v216_v31 = vmul.f32 %v200_v29, %v130_v25  ;;  %v133_v32 = vadd.f32 %v1004_v18, %v132_v30  ;;  %v839_v34 = vpop.eup %838 }
  0x95   :  { %v263_v40 = vmul.f32 %v839_v34, %v247_v36 }
  0x96   :  { %840 = vtanh.f32 %v216_v31  ;;  %v169_v33 = vmul.f32 %v133_v32, %v133_v32  ;;  %v249_v57 = vmul.f32 0.5, %v133_v32 }
  0x97   :  { %v279_v46 = vadd.f32 %v263_v40, %v247_v36 }
  0x98   :  { %v185_v35 = vmul.f32 0.035677407, %v169_v33 }
  0x9a   :  { %v201_v37 = vadd.f32 0.7978846, %v185_v35 }
  0x9b   :  { %v134_v39 = vpop.f32.mrf.mxu0 }
  0x9c   :  { %v841_v41 = vpop.eup %840  ;;  %v135_v42 = vadd.f32 %v1004_v18, %v134_v39  ;;  %v217_v44 = vmul.f32 %v201_v37, %v133_v32 }
  0x9d   :  { %v264_v43 = vmul.f32 %v841_v41, %v248_v38 }
  0x9e   :  { %v170_v45 = vmul.f32 %v135_v42, %v135_v42  ;;  %842 = vtanh.f32 %v217_v44  ;;  %v250_v59 = vmul.f32 0.5, %v135_v42 }
  0x9f   :  { %v280_v47 = vadd.f32 %v264_v43, %v248_v38 }
  0xa0   :  { %v186_v48 = vmul.f32 0.035677407, %v170_v45 }
  0xa1   :  { %v295_v49 = vpack.c.bf16 %v280_v47, %v279_v46 }
  0xa2   :  { %v202_v50 = vadd.f32 0.7978846, %v186_v48 }
  0xa3   :  { %v137_v51 = vpop.f32.mrf.mxu0  ;;  %379 = vmatmul.bf16.vlgmr.msra.gmra.mxu1 %v295_v49 }
  0xa4   :  { %v218_v52 = vmul.f32 %v202_v50, %v135_v42  ;;  %v138_v53 = vadd.f32 %v1004_v18, %v137_v51  ;;  %v843_v55 = vpop.eup %842 }
  0xa5   :  { %v265_v61 = vmul.f32 %v843_v55, %v249_v57 }
  0xa6   :  { %844 = vtanh.f32 %v218_v52  ;;  %v171_v54 = vmul.f32 %v138_v53, %v138_v53  ;;  %v251_v14 = vmul.f32 0.5, %v138_v53 }
  0xa7   :  { %v281_v3 = vadd.f32 %v265_v61, %v249_v57 }
  0xa8   :  { %v187_v56 = vmul.f32 0.035677407, %v171_v54 }
  0xaa   :  { %v203_v58 = vadd.f32 0.7978846, %v187_v56 }
  0xab   :  { %v139_v60 = vpop.f32.mrf.mxu0 }
  0xac   :  { %v845_v62 = vpop.eup %844  ;;  %v140_v63 = vadd.f32 %v1004_v18, %v139_v60  ;;  %v219_v1 = vmul.f32 %v203_v58, %v138_v53 }
  0xad   :  { %v266_v0 = vmul.f32 %v845_v62, %v250_v59 }
  0xae   :  { %v172_v2 = vmul.f32 %v140_v63, %v140_v63  ;;  %846 = vtanh.f32 %v219_v1  ;;  %v252_v16 = vmul.f32 0.5, %v140_v63 }
  0xaf   :  { %v282_v4 = vadd.f32 %v266_v0, %v250_v59 }
  0xb0   :  { %v188_v5 = vmul.f32 0.035677407, %v172_v2 }
  0xb1   :  { %v296_v6 = vpack.c.bf16 %v282_v4, %v281_v3 }
  0xb2   :  { %v204_v7 = vadd.f32 0.7978846, %v188_v5 }
  0xb3   :  { %v142_v8 = vpop.f32.mrf.mxu0  ;;  %384 = vmatmul.bf16.gmra.mxu1 %v296_v6 }
  0xb4   :  { %v220_v9 = vmul.f32 %v204_v7, %v140_v63  ;;  %v143_v10 = vadd.f32 %v1004_v18, %v142_v8  ;;  %v847_v12 = vpop.eup %846 }
  0xb5   :  { %v267_v19 = vmul.f32 %v847_v12, %v251_v14 }
  0xb6   :  { %848 = vtanh.f32 %v220_v9  ;;  %v173_v11 = vmul.f32 %v143_v10, %v143_v10  ;;  %v253_v36 = vmul.f32 0.5, %v143_v10 }
  0xb7   :  { %v283_v25 = vadd.f32 %v267_v19, %v251_v14 }
  0xb8   :  { %v189_v13 = vmul.f32 0.035677407, %v173_v11 }
  0xba   :  { %v205_v15 = vadd.f32 0.7978846, %v189_v13 }
  0xbb   :  { %v144_v17 = vpop.f32.mrf.mxu0 }
  0xbc   :  { %v849_v20 = vpop.eup %848  ;;  %v145_v21 = vadd.f32 %v1004_v18, %v144_v17  ;;  %v221_v23 = vmul.f32 %v205_v15, %v143_v10 }
  0xbd   :  { %v268_v22 = vmul.f32 %v849_v20, %v252_v16 }
  0xbe   :  { %v174_v24 = vmul.f32 %v145_v21, %v145_v21  ;;  %850 = vtanh.f32 %v221_v23  ;;  %v254_v38 = vmul.f32 0.5, %v145_v21 }
  0xbf   :  { %v284_v26 = vadd.f32 %v268_v22, %v252_v16 }
  0xc0   :  { %v190_v27 = vmul.f32 0.035677407, %v174_v24 }
  0xc1   :  { %v297_v28 = vpack.c.bf16 %v284_v26, %v283_v25 }
  0xc2   :  { %v206_v29 = vadd.f32 0.7978846, %v190_v27 }
  0xc3   :  { %v147_v30 = vpop.f32.mrf.mxu0  ;;  %389 = vmatmul.bf16.gmra.mxu1 %v297_v28 }
  0xc4   :  { %v222_v31 = vmul.f32 %v206_v29, %v145_v21  ;;  %v148_v32 = vadd.f32 %v1004_v18, %v147_v30  ;;  %v851_v34 = vpop.eup %850 }
  0xc5   :  { %v269_v40 = vmul.f32 %v851_v34, %v253_v36 }
  0xc6   :  { %852 = vtanh.f32 %v222_v31  ;;  %v175_v33 = vmul.f32 %v148_v32, %v148_v32  ;;  %v255_v57 = vmul.f32 0.5, %v148_v32 }
  0xc7   :  { %v285_v46 = vadd.f32 %v269_v40, %v253_v36 }
  0xc8   :  { %v191_v35 = vmul.f32 0.035677407, %v175_v33 }
  0xca   :  { %v207_v37 = vadd.f32 0.7978846, %v191_v35 }
  0xcb   :  { %v149_v39 = vpop.f32.mrf.mxu0 }
  0xcc   :  { %v853_v41 = vpop.eup %852  ;;  %v150_v42 = vadd.f32 %v1004_v18, %v149_v39  ;;  %v223_v44 = vmul.f32 %v207_v37, %v148_v32 }
  0xcd   :  { %v270_v43 = vmul.f32 %v853_v41, %v254_v38 }
  0xce   :  { %v176_v45 = vmul.f32 %v150_v42, %v150_v42  ;;  %854 = vtanh.f32 %v223_v44  ;;  %v256_v59 = vmul.f32 0.5, %v150_v42 }
  0xcf   :  { %v286_v47 = vadd.f32 %v270_v43, %v254_v38 }
  0xd0   :  { %v192_v48 = vmul.f32 0.035677407, %v176_v45 }
  0xd1   :  { %v298_v49 = vpack.c.bf16 %v286_v47, %v285_v46 }
  0xd2   :  { %v208_v50 = vadd.f32 0.7978846, %v192_v48  ;;  %v819_v48 = vld [vmem:[%s1139_s5 + $0x38] sm:$0xff] }
  0xd3   :  { %v152_v51 = vpop.f32.mrf.mxu0  ;;  %394 = vmatmul.bf16.gmra.mxu1 %v298_v49  ;;  %622 = vmatpush.bf16.msra.mxu2 %v819_v48 }
  0xd4   :  { %v224_v52 = vmul.f32 %v208_v50, %v150_v42  ;;  %v153_v53 = vadd.f32 %v1004_v18, %v152_v51  ;;  %v855_v55 = vpop.eup %854  ;;  %828 = vmatpush.bf16.msrb.mxu3 %v819_v48 }
  0xd5   :  { %v271_v61 = vmul.f32 %v855_v55, %v255_v57 }
  0xd6   :  { %856 = vtanh.f32 %v224_v52  ;;  %v177_v54 = vmul.f32 %v153_v53, %v153_v53  ;;  %v257_v14 = vmul.f32 0.5, %v153_v53 }
  0xd7   :  { %v287_v3 = vadd.f32 %v271_v61, %v255_v57 }
  0xd8   :  { %v193_v56 = vmul.f32 0.035677407, %v177_v54 }
  0xda   :  { %v209_v58 = vadd.f32 0.7978846, %v193_v56 }
  0xdb   :  { %v154_v60 = vpop.f32.mrf.mxu0 }
  0xdc   :  { %v857_v62 = vpop.eup %856  ;;  %v155_v63 = vadd.f32 %v1004_v18, %v154_v60  ;;  %v225_v1 = vmul.f32 %v209_v58, %v153_v53  ;;  %v817_v53 = vld [vmem:[%s1139_s5 + $0x28] sm:$0xff]  ;;  %v816_v58 = vld [vmem:[%s1139_s5 + $0x20] sm:$0xff] }
  0xdd   :  { %v272_v0 = vmul.f32 %v857_v62, %v256_v59 }
  0xde   :  { %v178_v2 = vmul.f32 %v155_v63, %v155_v63  ;;  %858 = vtanh.f32 %v225_v1  ;;  %v258_v16 = vmul.f32 0.5, %v155_v63  ;;  %v814_v1 = vld [vmem:[%s1139_s5 + $0x10] sm:$0xff] }
  0xdf   :  { %v288_v4 = vadd.f32 %v272_v0, %v256_v59 }
  0xe0   :  { %v194_v5 = vmul.f32 0.035677407, %v178_v2  ;;  %v813_v2 = vld [vmem:[%s1139_s5 + $0x8] sm:$0xff] }
  0xe1   :  { %v299_v6 = vpack.c.bf16 %v288_v4, %v287_v3  ;;  %v812_v3 = vld [vmem:[%s1139_s5] sm:$0xff] }
  0xe2   :  { %v210_v7 = vadd.f32 0.7978846, %v194_v5  ;;  %v1049_v4 = vld [vmem:[%s1138_s4] ss:$0 sm:$0xff] }
  0xe3   :  { %v157_v8 = vpop.f32.mrf.mxu0  ;;  %399 = vmatmul.bf16.gmra.mxu1 %v299_v6 }
  0xe4   :  { %v226_v9 = vmul.f32 %v210_v7, %v155_v63  ;;  %v158_v10 = vadd.f32 %v1004_v18, %v157_v8  ;;  %v859_v12 = vpop.eup %858  ;;  %v815_v63 = vld [vmem:[%s1139_s5 + $0x18] sm:$0xff] }
  0xe5   :  { %v273_v19 = vmul.f32 %v859_v12, %v257_v14 }
  0xe6   :  { %860 = vtanh.f32 %v226_v9  ;;  %v179_v11 = vmul.f32 %v158_v10, %v158_v10  ;;  %v259_v36 = vmul.f32 0.5, %v158_v10 }
  0xe7   :  { %v289_v25 = vadd.f32 %v273_v19, %v257_v14 }
  0xe8   :  { %v195_v13 = vmul.f32 0.035677407, %v179_v11 }
  0xea   :  { %v211_v15 = vadd.f32 0.7978846, %v195_v13 }
  0xeb   :  { %v159_v17 = vpop.f32.mrf.mxu0 }
  0xec   :  { %v861_v20 = vpop.eup %860  ;;  %v160_v21 = vadd.f32 %v1004_v18, %v159_v17  ;;  %v227_v23 = vmul.f32 %v211_v15, %v158_v10 }
  0xed   :  { %v274_v22 = vmul.f32 %v861_v20, %v258_v16 }
  0xee   :  { %v180_v24 = vmul.f32 %v160_v21, %v160_v21  ;;  %862 = vtanh.f32 %v227_v23  ;;  %v260_v38 = vmul.f32 0.5, %v160_v21 }
  0xef   :  { %v290_v26 = vadd.f32 %v274_v22, %v258_v16 }
  0xf0   :  { %v196_v27 = vmul.f32 0.035677407, %v180_v24 }
  0xf1   :  { %v300_v28 = vpack.c.bf16 %v290_v26, %v289_v25 }
  0xf2   :  { %v212_v29 = vadd.f32 0.7978846, %v196_v27 }
  0xf3   :  { %v162_v30 = vpop.f32.mrf.mxu0  ;;  %404 = vmatmul.bf16.gmra.mxu1 %v300_v28 }
  0xf4   :  { %v228_v31 = vmul.f32 %v212_v29, %v160_v21  ;;  %v163_v32 = vadd.f32 %v1004_v18, %v162_v30  ;;  %v863_v34 = vpop.eup %862 }
  0xf5   :  { %v275_v40 = vmul.f32 %v863_v34, %v259_v36 }
  0xf6   :  { %864 = vtanh.f32 %v228_v31  ;;  %v181_v33 = vmul.f32 %v163_v32, %v163_v32  ;;  %v261_v55 = vmul.f32 0.5, %v163_v32 }
  0xf7   :  { %v291_v46 = vadd.f32 %v275_v40, %v259_v36 }
  0xf8   :  { %v197_v35 = vmul.f32 0.035677407, %v181_v33 }
  0xfa   :  { %v213_v37 = vadd.f32 0.7978846, %v197_v35 }
  0xfb   :  { %v164_v39 = vpop.f32.mrf.mxu0 }
  0xfc   :  { %v865_v41 = vpop.eup %864  ;;  %v165_v42 = vadd.f32 %v1004_v18, %v164_v39  ;;  %v229_v44 = vmul.f32 %v213_v37, %v163_v32  ;;  %v818_v18 = vld [vmem:[%s1139_s5 + $0x30] sm:$0xff] }
  0xfd   :  { %v276_v43 = vmul.f32 %v865_v41, %v260_v38  ;;  %623 = vmatpush.bf16.msra.mxu2 %v818_v18  ;;  %829 = vmatpush.bf16.msrb.mxu3 %v818_v18 }
  0xfe   :  { %v182_v45 = vmul.f32 %v165_v42, %v165_v42  ;;  %866 = vtanh.f32 %v229_v44  ;;  %v262_v56 = vmul.f32 0.5, %v165_v42 }
  0xff   :  { %v292_v47 = vadd.f32 %v276_v43, %v260_v38 }
 0x100   :  { %v198_v49 = vmul.f32 0.035677407, %v182_v45 }
 0x101   :  { %v301_v50 = vpack.c.bf16 %v292_v47, %v291_v46  ;;  %624 = vmatpush.bf16.msra.mxu2 %v817_v53  ;;  %830 = vmatpush.bf16.msrb.mxu3 %v817_v53 }
 0x102   :  { %v214_v51 = vadd.f32 0.7978846, %v198_v49 }
 0x103   :  { %409 = vmatmul.bf16.vlgmr.msra.gmra.mxu3 %v301_v50 }
 0x104   :  { %v230_v52 = vmul.f32 %v214_v51, %v165_v42  ;;  %v867_v54 = vpop.eup %866 }
 0x105   :  { %v277_v57 = vmul.f32 %v867_v54, %v261_v55  ;;  %625 = vmatpush.bf16.msra.mxu2 %v816_v58  ;;  %831 = vmatpush.bf16.msrb.mxu3 %v816_v58 }
 0x106   :  { %868 = vtanh.f32 %v230_v52 }
 0x107   :  { %v293_v61 = vadd.f32 %v277_v57, %v261_v55 }
 0x109   :  { %626 = vmatpush.bf16.msra.mxu2 %v815_v63  ;;  %832 = vmatpush.bf16.msrb.mxu3 %v815_v63 }
 0x10c   :  { %v869_v59 = vpop.eup %868 }
 0x10d   :  { %v278_v60 = vmul.f32 %v869_v59, %v262_v56  ;;  %627 = vmatpush.bf16.msra.mxu2 %v814_v1  ;;  %833 = vmatpush.bf16.msrb.mxu3 %v814_v1 }
 0x10f   :  { %v294_v62 = vadd.f32 %v278_v60, %v262_v56 }
 0x111   :  { %v302_v0 = vpack.c.bf16 %v294_v62, %v293_v61  ;;  %628 = vmatpush.bf16.msra.mxu2 %v813_v2  ;;  %834 = vmatpush.bf16.msrb.mxu3 %v813_v2 }
 0x113   :  { %414 = vmatmul.bf16.gmra.mxu3 %v302_v0 }
 0x115   :  { %629 = vmatpush.bf16.msra.mxu2 %v812_v3  ;;  %835 = vmatpush.bf16.msrb.mxu3 %v812_v3 }
 0x120   :  { %v380_v5 = vpop.f32.mrf.mxu1 }
 0x121   :  { %v381_v6 = vadd.f32 %v1049_v4, %v380_v5 }
 0x123   :  { %v420_v7 = vmul.f32 %v381_v6, %v381_v6  ;;  %v500_v23 = vmul.f32 0.5, %v381_v6 }
 0x125   :  { %v436_v8 = vmul.f32 0.035677407, %v420_v7 }
 0x127   :  { %v452_v9 = vadd.f32 0.7978846, %v436_v8 }
 0x128   :  { %v382_v10 = vpop.f32.mrf.mxu1 }
 0x129   :  { %v383_v11 = vadd.f32 %v1049_v4, %v382_v10  ;;  %v468_v12 = vmul.f32 %v452_v9, %v381_v6 }
 0x12b   :  { %v421_v13 = vmul.f32 %v383_v11, %v383_v11  ;;  %870 = vtanh.f32 %v468_v12  ;;  %v501_v25 = vmul.f32 0.5, %v383_v11 }
 0x12d   :  { %v437_v14 = vmul.f32 0.035677407, %v421_v13 }
 0x12f   :  { %v453_v15 = vadd.f32 0.7978846, %v437_v14 }
 0x130   :  { %v385_v16 = vpop.f32.mrf.mxu1 }
 0x131   :  { %v469_v17 = vmul.f32 %v453_v15, %v383_v11  ;;  %v386_v19 = vadd.f32 %v1049_v4, %v385_v16  ;;  %v871_v21 = vpop.eup %870 }
 0x132   :  { %v516_v27 = vmul.f32 %v871_v21, %v500_v23 }
 0x133   :  { %872 = vtanh.f32 %v469_v17  ;;  %v422_v20 = vmul.f32 %v386_v19, %v386_v19  ;;  %v502_v44 = vmul.f32 0.5, %v386_v19 }
 0x134   :  { %v532_v33 = vadd.f32 %v516_v27, %v500_v23 }
 0x135   :  { %v438_v22 = vmul.f32 0.035677407, %v422_v20 }
 0x137   :  { %v454_v24 = vadd.f32 0.7978846, %v438_v22 }
 0x138   :  { %v387_v26 = vpop.f32.mrf.mxu1 }
 0x139   :  { %v873_v28 = vpop.eup %872  ;;  %v388_v29 = vadd.f32 %v1049_v4, %v387_v26  ;;  %v470_v31 = vmul.f32 %v454_v24, %v386_v19 }
 0x13a   :  { %v517_v30 = vmul.f32 %v873_v28, %v501_v25 }
 0x13b   :  { %v423_v32 = vmul.f32 %v388_v29, %v388_v29  ;;  %874 = vtanh.f32 %v470_v31  ;;  %v503_v46 = vmul.f32 0.5, %v388_v29 }
 0x13c   :  { %v533_v34 = vadd.f32 %v517_v30, %v501_v25 }
 0x13d   :  { %v439_v35 = vmul.f32 0.035677407, %v423_v32 }
 0x13e   :  { %v548_v36 = vpack.c.bf16 %v533_v34, %v532_v33 }
 0x13f   :  { %v455_v37 = vadd.f32 0.7978846, %v439_v35 }
 0x140   :  { %v390_v38 = vpop.f32.mrf.mxu1  ;;  %630 = vmatmul.bf16.vlgmr.msra.gmra.mxu2 %v548_v36 }
 0x141   :  { %v471_v39 = vmul.f32 %v455_v37, %v388_v29  ;;  %v391_v40 = vadd.f32 %v1049_v4, %v390_v38  ;;  %v875_v42 = vpop.eup %874 }
 0x142   :  { %v518_v48 = vmul.f32 %v875_v42, %v502_v44 }
 0x143   :  { %876 = vtanh.f32 %v471_v39  ;;  %v424_v41 = vmul.f32 %v391_v40, %v391_v40  ;;  %v504_v0 = vmul.f32 0.5, %v391_v40 }
 0x144   :  { %v534_v53 = vadd.f32 %v518_v48, %v502_v44 }
 0x145   :  { %v440_v43 = vmul.f32 0.035677407, %v424_v41 }
 0x147   :  { %v456_v45 = vadd.f32 0.7978846, %v440_v43 }
 0x148   :  { %v392_v47 = vpop.f32.mrf.mxu1 }
 0x149   :  { %v877_v49 = vpop.eup %876  ;;  %v393_v50 = vadd.f32 %v1049_v4, %v392_v47  ;;  %v472_v18 = vmul.f32 %v456_v45, %v391_v40 }
 0x14a   :  { %v519_v51 = vmul.f32 %v877_v49, %v503_v46 }
 0x14b   :  { %v425_v52 = vmul.f32 %v393_v50, %v393_v50  ;;  %878 = vtanh.f32 %v472_v18  ;;  %v505_v2 = vmul.f32 0.5, %v393_v50 }
 0x14c   :  { %v535_v54 = vadd.f32 %v519_v51, %v503_v46 }
 0x14d   :  { %v441_v55 = vmul.f32 0.035677407, %v425_v52 }
 0x14e   :  { %v549_v56 = vpack.c.bf16 %v535_v54, %v534_v53 }
 0x14f   :  { %v457_v57 = vadd.f32 0.7978846, %v441_v55 }
 0x150   :  { %v395_v58 = vpop.f32.mrf.mxu1  ;;  %635 = vmatmul.bf16.gmra.mxu2 %v549_v56 }
 0x151   :  { %v473_v59 = vmul.f32 %v457_v57, %v393_v50  ;;  %v396_v60 = vadd.f32 %v1049_v4, %v395_v58  ;;  %v879_v62 = vpop.eup %878 }
 0x152   :  { %v520_v5 = vmul.f32 %v879_v62, %v504_v0 }
 0x153   :  { %880 = vtanh.f32 %v473_v59  ;;  %v426_v61 = vmul.f32 %v396_v60, %v396_v60  ;;  %v506_v23 = vmul.f32 0.5, %v396_v60 }
 0x154   :  { %v536_v11 = vadd.f32 %v520_v5, %v504_v0 }
 0x155   :  { %v442_v63 = vmul.f32 0.035677407, %v426_v61 }
 0x157   :  { %v458_v1 = vadd.f32 0.7978846, %v442_v63 }
 0x158   :  { %v397_v3 = vpop.f32.mrf.mxu1 }
 0x159   :  { %v881_v6 = vpop.eup %880  ;;  %v398_v7 = vadd.f32 %v1049_v4, %v397_v3  ;;  %v474_v9 = vmul.f32 %v458_v1, %v396_v60 }
 0x15a   :  { %v521_v8 = vmul.f32 %v881_v6, %v505_v2 }
 0x15b   :  { %v427_v10 = vmul.f32 %v398_v7, %v398_v7  ;;  %882 = vtanh.f32 %v474_v9  ;;  %v507_v25 = vmul.f32 0.5, %v398_v7 }
 0x15c   :  { %v537_v12 = vadd.f32 %v521_v8, %v505_v2 }
 0x15d   :  { %v443_v13 = vmul.f32 0.035677407, %v427_v10 }
 0x15e   :  { %v550_v14 = vpack.c.bf16 %v537_v12, %v536_v11 }
 0x15f   :  { %v459_v15 = vadd.f32 0.7978846, %v443_v13 }
 0x160   :  { %v400_v16 = vpop.f32.mrf.mxu1  ;;  %640 = vmatmul.bf16.gmra.mxu2 %v550_v14 }
 0x161   :  { %v475_v17 = vmul.f32 %v459_v15, %v398_v7  ;;  %v401_v19 = vadd.f32 %v1049_v4, %v400_v16  ;;  %v883_v21 = vpop.eup %882 }
 0x162   :  { %v522_v27 = vmul.f32 %v883_v21, %v506_v23 }
 0x163   :  { %884 = vtanh.f32 %v475_v17  ;;  %v428_v20 = vmul.f32 %v401_v19, %v401_v19  ;;  %v508_v44 = vmul.f32 0.5, %v401_v19 }
 0x164   :  { %v538_v33 = vadd.f32 %v522_v27, %v506_v23 }
 0x165   :  { %v444_v22 = vmul.f32 0.035677407, %v428_v20 }
 0x167   :  { %v460_v24 = vadd.f32 0.7978846, %v444_v22 }
 0x168   :  { %v402_v26 = vpop.f32.mrf.mxu1 }
 0x169   :  { %v885_v28 = vpop.eup %884  ;;  %v403_v29 = vadd.f32 %v1049_v4, %v402_v26  ;;  %v476_v31 = vmul.f32 %v460_v24, %v401_v19 }
 0x16a   :  { %v523_v30 = vmul.f32 %v885_v28, %v507_v25 }
 0x16b   :  { %v429_v32 = vmul.f32 %v403_v29, %v403_v29  ;;  %886 = vtanh.f32 %v476_v31  ;;  %v509_v46 = vmul.f32 0.5, %v403_v29 }
 0x16c   :  { %v539_v34 = vadd.f32 %v523_v30, %v507_v25 }
 0x16d   :  { %v445_v35 = vmul.f32 0.035677407, %v429_v32 }
 0x16e   :  { %v551_v36 = vpack.c.bf16 %v539_v34, %v538_v33 }
 0x16f   :  { %v461_v37 = vadd.f32 0.7978846, %v445_v35 }
 0x170   :  { %v405_v38 = vpop.f32.mrf.mxu1  ;;  %645 = vmatmul.bf16.gmra.mxu2 %v551_v36 }
 0x171   :  { %v477_v39 = vmul.f32 %v461_v37, %v403_v29  ;;  %v406_v40 = vadd.f32 %v1049_v4, %v405_v38  ;;  %v887_v42 = vpop.eup %886 }
 0x172   :  { %v524_v48 = vmul.f32 %v887_v42, %v508_v44 }
 0x173   :  { %888 = vtanh.f32 %v477_v39  ;;  %v430_v41 = vmul.f32 %v406_v40, %v406_v40  ;;  %v510_v60 = vmul.f32 0.5, %v406_v40 }
 0x174   :  { %v540_v53 = vadd.f32 %v524_v48, %v508_v44 }
 0x175   :  { %v446_v43 = vmul.f32 0.035677407, %v430_v41 }
 0x177   :  { %v462_v45 = vadd.f32 0.7978846, %v446_v43 }
 0x178   :  { %v407_v47 = vpop.f32.mrf.mxu1 }
 0x179   :  { %v889_v49 = vpop.eup %888  ;;  %v408_v50 = vadd.f32 %v1049_v4, %v407_v47  ;;  %v478_v18 = vmul.f32 %v462_v45, %v406_v40  ;;  %v573_v47 = vstv %s1140_s6 }
 0x17a   :  { %v525_v51 = vmul.f32 %v889_v49, %v509_v46 }
 0x17b   :  { %v431_v52 = vmul.f32 %v408_v50, %v408_v50  ;;  %890 = vtanh.f32 %v478_v18  ;;  %v511_v63 = vmul.f32 0.5, %v408_v50 }
 0x17c   :  { %v541_v54 = vadd.f32 %v525_v51, %v509_v46 }
 0x17d   :  { %v447_v55 = vmul.f32 0.035677407, %v431_v52 }
 0x17e   :  { %v552_v56 = vpack.c.bf16 %v541_v54, %v540_v53 }
 0x17f   :  { %v463_v57 = vadd.f32 0.7978846, %v447_v55 }
 0x180   :  { %650 = vmatmul.bf16.gmra.mxu2 %v552_v56 }
 0x181   :  { %v479_v58 = vmul.f32 %v463_v57, %v408_v50  ;;  %v891_v59 = vpop.eup %890 }
 0x182   :  { %v526_v0 = vmul.f32 %v891_v59, %v510_v60 }
 0x183   :  { %892 = vtanh.f32 %v479_v58 }
 0x184   :  { %v542_v6 = vadd.f32 %v526_v0, %v510_v60 }
 0x186   :  { %v410_v61 = vpop.f32.mrf.mxu3 }
 0x187   :  { %v411_v62 = vadd.f32 %v1049_v4, %v410_v61 }
 0x189   :  { %v893_v1 = vpop.eup %892  ;;  %v432_v2 = vmul.f32 %v411_v62, %v411_v62  ;;  %v512_v23 = vmul.f32 0.5, %v411_v62 }
 0x18a   :  { %v527_v3 = vmul.f32 %v893_v1, %v511_v63 }
 0x18b   :  { %v448_v5 = vmul.f32 0.035677407, %v432_v2 }
 0x18c   :  { %v543_v7 = vadd.f32 %v527_v3, %v511_v63 }
 0x18d   :  { %v464_v8 = vadd.f32 0.7978846, %v448_v5 }
 0x18e   :  { %v412_v9 = vpop.f32.mrf.mxu3  ;;  %v553_v10 = vpack.c.bf16 %v543_v7, %v542_v6 }
 0x18f   :  { %v413_v11 = vadd.f32 %v1049_v4, %v412_v9  ;;  %v480_v12 = vmul.f32 %v464_v8, %v411_v62 }
 0x190   :  { %655 = vmatmul.bf16.gmra.mxu2 %v553_v10 }
 0x191   :  { %v433_v13 = vmul.f32 %v413_v11, %v413_v11  ;;  %894 = vtanh.f32 %v480_v12  ;;  %v513_v26 = vmul.f32 0.5, %v413_v11 }
 0x193   :  { %v449_v14 = vmul.f32 0.035677407, %v433_v13 }
 0x195   :  { %v465_v15 = vadd.f32 0.7978846, %v449_v14 }
 0x196   :  { %v415_v16 = vpop.f32.mrf.mxu3 }
 0x197   :  { %v481_v17 = vmul.f32 %v465_v15, %v413_v11  ;;  %v416_v19 = vadd.f32 %v1049_v4, %v415_v16  ;;  %v895_v21 = vpop.eup %894 }
 0x198   :  { %v528_v25 = vmul.f32 %v895_v21, %v512_v23 }
 0x199   :  { %896 = vtanh.f32 %v481_v17  ;;  %v434_v20 = vmul.f32 %v416_v19, %v416_v19  ;;  %v514_v40 = vmul.f32 0.5, %v416_v19 }
 0x19a   :  { %v544_v33 = vadd.f32 %v528_v25, %v512_v23 }
 0x19b   :  { %v450_v22 = vmul.f32 0.035677407, %v434_v20 }
 0x19d   :  { %v466_v24 = vadd.f32 0.7978846, %v450_v22 }
 0x19e   :  { %v417_v27 = vpop.f32.mrf.mxu3 }
 0x19f   :  { %v897_v28 = vpop.eup %896  ;;  %v418_v29 = vadd.f32 %v1049_v4, %v417_v27  ;;  %v482_v31 = vmul.f32 %v466_v24, %v416_v19 }
 0x1a0   :  { %v529_v30 = vmul.f32 %v897_v28, %v513_v26 }
 0x1a1   :  { %v435_v32 = vmul.f32 %v418_v29, %v418_v29  ;;  %898 = vtanh.f32 %v482_v31  ;;  %v515_v41 = vmul.f32 0.5, %v418_v29 }
 0x1a2   :  { %v545_v34 = vadd.f32 %v529_v30, %v513_v26 }
 0x1a3   :  { %v451_v35 = vmul.f32 0.035677407, %v435_v32 }
 0x1a4   :  { %v554_v36 = vpack.c.bf16 %v545_v34, %v544_v33 }
 0x1a5   :  { %v467_v37 = vadd.f32 0.7978846, %v451_v35 }
 0x1a6   :  { %660 = vmatmul.bf16.vlgmr.msrb.gmra.mxu3 %v554_v36 }
 0x1a7   :  { %v483_v38 = vmul.f32 %v467_v37, %v418_v29  ;;  %v899_v39 = vpop.eup %898 }
 0x1a8   :  { %v530_v42 = vmul.f32 %v899_v39, %v514_v40 }
 0x1a9   :  { %900 = vtanh.f32 %v483_v38 }
 0x1aa   :  { %v546_v45 = vadd.f32 %v530_v42, %v514_v40 }
 0x1af   :  { %v901_v43 = vpop.eup %900 }
 0x1b0   :  { %v531_v44 = vmul.f32 %v901_v43, %v515_v41 }
 0x1b2   :  { %v547_v4 = vadd.f32 %v531_v44, %v515_v41 }
 0x1b4   :  { %v555_v46 = vpack.c.bf16 %v547_v4, %v546_v45 }
 0x1b6   :  { %665 = vmatmul.bf16.gmra.mxu3 %v555_v46 }
 0x1c3   :  { %v631_v48 = vpop.f32.mrf.mxu2 }
 0x1c4   :  { %v632_v49 = vadd.f32 %v631_v48, %v573_v47 }
 0x1c6   :  { %672 = vst.msk [vmem:[%s1141_s7] sm:$0xff] %vm671_vm2, %v632_v49 }
 0x1cb   :  { %v633_v50 = vpop.f32.mrf.mxu2 }
 0x1cc   :  { %v634_v51 = vadd.f32 %v633_v50, %v573_v47 }
 0x1ce   :  { %673 = vst.msk [vmem:[%s1141_s7 + $0x8] sm:$0xff] %vm671_vm2, %v634_v51 }
 0x1d3   :  { %v636_v18 = vpop.f32.mrf.mxu2 }
 0x1d4   :  { %v637_v52 = vadd.f32 %v636_v18, %v573_v47 }
 0x1d6   :  { %674 = vst.msk [vmem:[%s1141_s7 + $0x10] sm:$0xff] %vm671_vm2, %v637_v52 }
 0x1db   :  { %v638_v53 = vpop.f32.mrf.mxu2 }
 0x1dc   :  { %v639_v54 = vadd.f32 %v638_v53, %v573_v47 }
 0x1de   :  { %675 = vst.msk [vmem:[%s1141_s7 + $0x18] sm:$0xff] %vm671_vm2, %v639_v54 }
 0x1e3   :  { %v641_v55 = vpop.f32.mrf.mxu2 }
 0x1e4   :  { %v642_v56 = vadd.f32 %v641_v55, %v573_v47 }
 0x1e6   :  { %676 = vst.msk [vmem:[%s1141_s7 + $0x20] sm:$0xff] %vm671_vm2, %v642_v56 }
 0x1eb   :  { %v643_v57 = vpop.f32.mrf.mxu2 }
 0x1ec   :  { %v644_v58 = vadd.f32 %v643_v57, %v573_v47 }
 0x1ee   :  { %677 = vst.msk [vmem:[%s1141_s7 + $0x28] sm:$0xff] %vm671_vm2, %v644_v58 }
 0x1f3   :  { %v646_v59 = vpop.f32.mrf.mxu2 }
 0x1f4   :  { %v647_v60 = vadd.f32 %v646_v59, %v573_v47 }
 0x1f6   :  { %678 = vst.msk [vmem:[%s1141_s7 + $0x30] sm:$0xff] %vm671_vm2, %v647_v60 }
 0x1fb   :  { %v648_v61 = vpop.f32.mrf.mxu2 }
 0x1fc   :  { %v649_v62 = vadd.f32 %v648_v61, %v573_v47 }
 0x1fe   :  { %679 = vst.msk [vmem:[%s1141_s7 + $0x38] sm:$0xff] %vm671_vm2, %v649_v62 }
 0x203   :  { %v651_v63 = vpop.f32.mrf.mxu2 }
 0x204   :  { %v652_v0 = vadd.f32 %v651_v63, %v573_v47 }
 0x206   :  { %680 = vst.msk [vmem:[%s1141_s7 + $0x40] sm:$0xff] %vm671_vm2, %v652_v0 }
 0x20b   :  { %v653_v1 = vpop.f32.mrf.mxu2 }
 0x20c   :  { %v654_v2 = vadd.f32 %v653_v1, %v573_v47 }
 0x20e   :  { %681 = vst.msk [vmem:[%s1141_s7 + $0x48] sm:$0xff] %vm671_vm2, %v654_v2 }
 0x213   :  { %v656_v3 = vpop.f32.mrf.mxu2 }
 0x214   :  { %v657_v5 = vadd.f32 %v656_v3, %v573_v47 }
 0x216   :  { %682 = vst.msk [vmem:[%s1141_s7 + $0x50] sm:$0xff] %vm671_vm2, %v657_v5 }
 0x21b   :  { %v658_v6 = vpop.f32.mrf.mxu2 }
 0x21c   :  { %v659_v7 = vadd.f32 %v658_v6, %v573_v47 }
 0x21e   :  { %683 = vst.msk [vmem:[%s1141_s7 + $0x58] sm:$0xff] %vm671_vm2, %v659_v7 }
 0x229   :  { %v661_v8 = vpop.f32.mrf.mxu3 }
 0x22a   :  { %v662_v9 = vadd.f32 %v661_v8, %v573_v47 }
 0x22c   :  { %684 = vst.msk [vmem:[%s1141_s7 + $0x60] sm:$0xff] %vm671_vm2, %v662_v9 }
 0x231   :  { %v663_v10 = vpop.f32.mrf.mxu3 }
 0x232   :  { %v664_v11 = vadd.f32 %v663_v10, %v573_v47 }
 0x234   :  { %685 = vst.msk [vmem:[%s1141_s7 + $0x68] sm:$0xff] %vm671_vm2, %v664_v11 }
 0x239   :  { %v666_v12 = vpop.f32.mrf.mxu3 }
 0x23a   :  { %v667_v13 = vadd.f32 %v666_v12, %v573_v47 }
 0x23c   :  { %686 = vst.msk [vmem:[%s1141_s7 + $0x70] sm:$0xff] %vm671_vm2, %v667_v13 }
 0x241   :  { %v668_v14 = vpop.f32.mrf.mxu3 }
 0x242   :  { %v669_v15 = vadd.f32 %v668_v14, %v573_v47 }
 0x244   :  { %687 = vst.msk [vmem:[%s1141_s7 + $0x78] sm:$0xff] %vm671_vm2, %v669_v15 }

</bundles_post_ra>
